<compile_context>
chip_gen: v7x
topology: tpu7x:2x2x1
jax: 0.10.0
libtpu: 0.0.40
codegen_flags: <defaults>
</compile_context>

<pallas_src>
import jax
import jax.numpy as jnp
from jax.experimental import pallas as pl
from jax.experimental.pallas import tpu as pltpu

LANES = 128
KPAD = 24          # max real contraction dim is 18 -> pad to multiple of 8
TILE_B_MAX = 512   # batch tile size once batch grows beyond this
# (in_features, out_features) per layer of model1
SIZES = [(1, 10), (10, 18), (18, 15), (15, 4), (4, 1)]


def _mlp_kernel(x_ref, wmid_ref, small_ref, o_ref):
    # small_ref rows: 0 = W1 (out features on lanes), 1 = W5 (in features on
    # lanes), 2..6 = b1..b5 (zero-padded to 128 lanes), 7 = zeros.
    x = x_ref[...]                                        # (TB, 1)

    # ---- layer 1 (K = 1): pure VPU broadcast-multiply, no MXU ----
    w1 = small_ref[0:1, :]                                # (1, LANES)
    b1 = small_ref[2:3, :]                                # (1, LANES)
    h = jnp.maximum(x * w1 + b1, 0.0)                     # (TB, LANES)

    # ---- layers 2-4: pre-transposed (in, out), K trimmed to KPAD ----
    # Padding lanes stay exactly zero through ReLU (ReLU(0) == 0), so slicing
    # to the first KPAD lanes is exact.
    for i in range(3):                                    # static unroll
        w = wmid_ref[i]                                   # (KPAD, LANES)
        b = small_ref[3 + i:4 + i, :]                     # (1, LANES)
        h = jnp.maximum(
            jnp.dot(h[:, :KPAD], w, preferred_element_type=jnp.float32) + b,
            0.0)                                          # (TB, LANES)

    # ---- layer 5 (N = 1): VPU multiply + lane reduce; bias folded into the
    # reduce (b5 sits in lane 0 of its row, all other lanes are zero) ----
    w5 = small_ref[1:2, :]                                # (1, LANES)
    b5 = small_ref[6:7, :]                                # (1, LANES)
    y = jnp.sum(h * w5 + b5, axis=-1, keepdims=True)      # (TB, 1)
    o_ref[...] = jnp.maximum(y, 0.0).astype(o_ref.dtype)


def pack_params(params):
    """Pack torch-convention (W:(out,in), b:(out,)) params into two slabs.

    Call ONCE at init; pass the resulting (wmid, small) slabs to
    model1_forward on every call (do not rebuild per forward).
    """
    (w1, b1), (w2, b2), (w3, b3), (w4, b4), (w5, b5) = params
    assert w1.shape[1] == 1 and w5.shape[0] == 1, \
        "fused kernel assumes input_size == output_size == 1 (model1 defaults)"

    def pad_wt(w):                        # (out, in) -> (KPAD, LANES) as (in, out)
        wt = jnp.asarray(w, jnp.float32).T
        buf = jnp.zeros((KPAD, LANES), jnp.float32)
        return buf.at[:wt.shape[0], :wt.shape[1]].set(wt)

    def pad_row(v):                       # (n,) or (out, in) -> (LANES,)
        v = jnp.asarray(v, jnp.float32).reshape(-1)
        return jnp.zeros((LANES,), jnp.float32).at[:v.shape[0]].set(v)

    wmid = jnp.stack([pad_wt(w2), pad_wt(w3), pad_wt(w4)])          # (3,24,128)
    small = jnp.stack([pad_row(w1), pad_row(w5),
                       pad_row(b1), pad_row(b2), pad_row(b3),
                       pad_row(b4), pad_row(b5),
                       jnp.zeros((LANES,), jnp.float32)])           # (8,128)
    return wmid, small


def model1_forward(x, wmid, small):
    """x: (batch, 1) f32. wmid/small: pre-packed slabs from pack_params()."""
    assert x.shape[1] == 1, "model1 default input_size == 1"
    batch = x.shape[0]
    tb = batch if batch <= TILE_B_MAX else TILE_B_MAX
    grid = (pl.cdiv(batch, tb),)

    flops = 2 * batch * sum(i * o for i, o in SIZES)
    bytes_accessed = 4 * (x.size + wmid.size + small.size + batch)

    return pl.pallas_call(
        _mlp_kernel,
        out_shape=jax.ShapeDtypeStruct((batch, 1), jnp.float32),
        grid=grid,
        in_specs=[
            pl.BlockSpec((tb, 1), lambda i: (i, 0)),
            pl.BlockSpec(wmid.shape, lambda i: (0, 0, 0)),   # VMEM-resident
            pl.BlockSpec(small.shape, lambda i: (0, 0)),     # VMEM-resident
        ],
        out_specs=pl.BlockSpec((tb, 1), lambda i: (i, 0)),
        compiler_params=pltpu.CompilerParams(
            dimension_semantics=("parallel",)),               # v7x 2-TC shard
        cost_estimate=pl.CostEstimate(flops=flops, transcendentals=0,
                                      bytes_accessed=bytes_accessed),
    )(x, wmid, small)


def init_params(key, input_size=1, output_size=1):
    """Deterministic init matching model1's layer shapes (torch Linear conv.)."""
    sizes = [(input_size, 10), (10, 18), (18, 15), (15, 4), (4, output_size)]
    params = []
    for fan_in, fan_out in sizes:
        key, kw, kb = jax.random.split(key, 3)
        bound = 1.0 / jnp.sqrt(jnp.float32(fan_in))
        w = jax.random.uniform(kw, (fan_out, fan_in), jnp.float32, -bound, bound)
        b = jax.random.uniform(kb, (fan_out,), jnp.float32, -bound, bound)
        params.append((w, b))
    return params


def reference_forward(x, params):
    h = x
    for w, b in params:
        h = jnp.maximum(h @ w.T + b[None, :], 0.0)
    return h


if __name__ == "__main__":
    key = jax.random.PRNGKey(0)
    key, kx = jax.random.split(key)

    batch, input_size, output_size = 8, 1, 1
    x = jax.random.normal(kx, (batch, input_size), jnp.float32)
    params = init_params(key, input_size, output_size)

    # Pack once at init (hoisted out of the per-call path).
    wmid, small = pack_params(params)
    wmid, small = jax.block_until_ready((wmid, small))

    fwd = jax.jit(model1_forward)
    out = fwd(x, wmid, small)
    out = jax.block_until_ready(out)

    ref = reference_forward(x, params)
    assert out.shape == (batch, output_size)
    assert jnp.allclose(out, ref, atol=1e-5, rtol=1e-5)

    print("KERNEL_OK")
</pallas_src>

<mosaic_0001>
module attributes {stable_mosaic.version = 11 : i64} {
  func.func @_mlp_kernel(%arg0: i32, %arg1: memref<8x1xf32, #tpu.memory_space<vmem>>, %arg2: memref<3x24x128xf32, #tpu.memory_space<vmem>>, %arg3: memref<8x128xf32, #tpu.memory_space<vmem>>, %arg4: memref<8x1xf32, #tpu.memory_space<vmem>>) attributes {dimension_semantics = [#tpu.dimension_semantics<parallel>], iteration_bounds = array<i64: 1>, scalar_prefetch = 0 : i64, scratch_operands = 0 : i64, tpu.core_type = #tpu.core_type<tc>, window_params = [{transform_indices = @transform_0, window_bounds = array<i64: 8, 1>}, {pipeline_mode = #tpu.pipeline_mode<synchronous>, transform_indices = @transform_1, window_bounds = array<i64: 3, 24, 128>}, {pipeline_mode = #tpu.pipeline_mode<synchronous>, transform_indices = @transform_2, window_bounds = array<i64: 8, 128>}, {transform_indices = @transform_3, window_bounds = array<i64: 8, 1>}]} {
    %c0 = arith.constant 0 : index
    %c0_0 = arith.constant 0 : index
    %0 = vector.load %arg1[%c0, %c0_0] : memref<8x1xf32, #tpu.memory_space<vmem>>, vector<8x1xf32>
    %c0_1 = arith.constant 0 : index
    %c0_2 = arith.constant 0 : index
    %1 = vector.load %arg3[%c0_1, %c0_2] : memref<8x128xf32, #tpu.memory_space<vmem>>, vector<1x128xf32>
    %c2 = arith.constant 2 : index
    %c0_3 = arith.constant 0 : index
    %2 = vector.load %arg3[%c2, %c0_3] : memref<8x128xf32, #tpu.memory_space<vmem>>, vector<1x128xf32>
    %3 = vector.broadcast %0 : vector<8x1xf32> to vector<8x128xf32>
    %4 = vector.broadcast %1 : vector<1x128xf32> to vector<8x128xf32>
    %5 = arith.mulf %3, %4 : vector<8x128xf32>
    %6 = vector.broadcast %2 : vector<1x128xf32> to vector<8x128xf32>
    %7 = arith.addf %5, %6 : vector<8x128xf32>
    %cst = arith.constant 0.000000e+00 : f32
    %8 = vector.broadcast %cst : f32 to vector<8x128xf32>
    %9 = arith.maximumf %7, %8 : vector<8x128xf32>
    %c0_4 = arith.constant 0 : index
    %c0_5 = arith.constant 0 : index
    %c0_6 = arith.constant 0 : index
    %10 = vector.load %arg2[%c0_4, %c0_5, %c0_6] : memref<3x24x128xf32, #tpu.memory_space<vmem>>, vector<1x24x128xf32>
    %11 = vector.shape_cast %10 : vector<1x24x128xf32> to vector<24x128xf32>
    %c3 = arith.constant 3 : index
    %c0_7 = arith.constant 0 : index
    %12 = vector.load %arg3[%c3, %c0_7] : memref<8x128xf32, #tpu.memory_space<vmem>>, vector<1x128xf32>
    %13 = vector.extract_strided_slice %9 {offsets = [0, 0], sizes = [8, 24], strides = [1, 1]} : vector<8x128xf32> to vector<8x24xf32>
    %cst_8 = arith.constant dense<0.000000e+00> : vector<8x128xf32>
    %14 = tpu.matmul %13, %11, %cst_8 {dimension_numbers = #tpu.dot_dimension_numbers<[1], [0], [0], [1], [0, 0, 1, 1], [], []>} : vector<8x24xf32>, vector<24x128xf32>, vector<8x128xf32> -> vector<8x128xf32>
    %15 = vector.broadcast %12 : vector<1x128xf32> to vector<8x128xf32>
    %16 = arith.addf %14, %15 : vector<8x128xf32>
    %cst_9 = arith.constant 0.000000e+00 : f32
    %17 = vector.broadcast %cst_9 : f32 to vector<8x128xf32>
    %18 = arith.maximumf %16, %17 : vector<8x128xf32>
    %c1 = arith.constant 1 : index
    %c0_10 = arith.constant 0 : index
    %c0_11 = arith.constant 0 : index
    %19 = vector.load %arg2[%c1, %c0_10, %c0_11] : memref<3x24x128xf32, #tpu.memory_space<vmem>>, vector<1x24x128xf32>
    %20 = vector.shape_cast %19 : vector<1x24x128xf32> to vector<24x128xf32>
    %c4 = arith.constant 4 : index
    %c0_12 = arith.constant 0 : index
    %21 = vector.load %arg3[%c4, %c0_12] : memref<8x128xf32, #tpu.memory_space<vmem>>, vector<1x128xf32>
    %22 = vector.extract_strided_slice %18 {offsets = [0, 0], sizes = [8, 24], strides = [1, 1]} : vector<8x128xf32> to vector<8x24xf32>
    %cst_13 = arith.constant dense<0.000000e+00> : vector<8x128xf32>
    %23 = tpu.matmul %22, %20, %cst_13 {dimension_numbers = #tpu.dot_dimension_numbers<[1], [0], [0], [1], [0, 0, 1, 1], [], []>} : vector<8x24xf32>, vector<24x128xf32>, vector<8x128xf32> -> vector<8x128xf32>
    %24 = vector.broadcast %21 : vector<1x128xf32> to vector<8x128xf32>
    %25 = arith.addf %23, %24 : vector<8x128xf32>
    %cst_14 = arith.constant 0.000000e+00 : f32
    %26 = vector.broadcast %cst_14 : f32 to vector<8x128xf32>
    %27 = arith.maximumf %25, %26 : vector<8x128xf32>
    %c2_15 = arith.constant 2 : index
    %c0_16 = arith.constant 0 : index
    %c0_17 = arith.constant 0 : index
    %28 = vector.load %arg2[%c2_15, %c0_16, %c0_17] : memref<3x24x128xf32, #tpu.memory_space<vmem>>, vector<1x24x128xf32>
    %29 = vector.shape_cast %28 : vector<1x24x128xf32> to vector<24x128xf32>
    %c5 = arith.constant 5 : index
    %c0_18 = arith.constant 0 : index
    %30 = vector.load %arg3[%c5, %c0_18] : memref<8x128xf32, #tpu.memory_space<vmem>>, vector<1x128xf32>
    %31 = vector.extract_strided_slice %27 {offsets = [0, 0], sizes = [8, 24], strides = [1, 1]} : vector<8x128xf32> to vector<8x24xf32>
    %cst_19 = arith.constant dense<0.000000e+00> : vector<8x128xf32>
    %32 = tpu.matmul %31, %29, %cst_19 {dimension_numbers = #tpu.dot_dimension_numbers<[1], [0], [0], [1], [0, 0, 1, 1], [], []>} : vector<8x24xf32>, vector<24x128xf32>, vector<8x128xf32> -> vector<8x128xf32>
    %33 = vector.broadcast %30 : vector<1x128xf32> to vector<8x128xf32>
    %34 = arith.addf %32, %33 : vector<8x128xf32>
    %cst_20 = arith.constant 0.000000e+00 : f32
    %35 = vector.broadcast %cst_20 : f32 to vector<8x128xf32>
    %36 = arith.maximumf %34, %35 : vector<8x128xf32>
    %c1_21 = arith.constant 1 : index
    %c0_22 = arith.constant 0 : index
    %37 = vector.load %arg3[%c1_21, %c0_22] : memref<8x128xf32, #tpu.memory_space<vmem>>, vector<1x128xf32>
    %c6 = arith.constant 6 : index
    %c0_23 = arith.constant 0 : index
    %38 = vector.load %arg3[%c6, %c0_23] : memref<8x128xf32, #tpu.memory_space<vmem>>, vector<1x128xf32>
    %39 = vector.broadcast %37 : vector<1x128xf32> to vector<8x128xf32>
    %40 = arith.mulf %36, %39 : vector<8x128xf32>
    %41 = vector.broadcast %38 : vector<1x128xf32> to vector<8x128xf32>
    %42 = arith.addf %40, %41 : vector<8x128xf32>
    %cst_24 = arith.constant dense<0.000000e+00> : vector<8xf32>
    %43 = vector.multi_reduction <add>, %42, %cst_24 [1] : vector<8x128xf32> to vector<8xf32>
    %44 = vector.shape_cast %43 : vector<8xf32> to vector<8x1xf32>
    %cst_25 = arith.constant 0.000000e+00 : f32
    %45 = vector.broadcast %cst_25 : f32 to vector<8x1xf32>
    %46 = arith.maximumf %44, %45 : vector<8x1xf32>
    %c0_26 = arith.constant 0 : index
    %c0_27 = arith.constant 0 : index
    %47 = vector.load %arg4[%c0_26, %c0_27] : memref<8x1xf32, #tpu.memory_space<vmem>>, vector<8x1xf32>
    tpu.vector_store %arg4[%c0_26, %c0_27], %46 {strides = array<i32>} : memref<8x1xf32, #tpu.memory_space<vmem>>, vector<8x1xf32>,
    return
  }
  func.func @transform_0(%arg0: i32) -> (i32, i32) {
    %c0_i32 = arith.constant 0 : i32
    %c0_i32_0 = arith.constant 0 : i32
    return %arg0, %c0_i32 : i32, i32
  }
  func.func @transform_1(%arg0: i32) -> (i32, i32, i32) {
    %c0_i32 = arith.constant 0 : i32
    %c0_i32_0 = arith.constant 0 : i32
    %c0_i32_1 = arith.constant 0 : i32
    %c0_i32_2 = arith.constant 0 : i32
    return %c0_i32, %c0_i32_0, %c0_i32_1 : i32, i32, i32
  }
  func.func @transform_2(%arg0: i32) -> (i32, i32) {
    %c0_i32 = arith.constant 0 : i32
    %c0_i32_0 = arith.constant 0 : i32
    %c0_i32_1 = arith.constant 0 : i32
    return %c0_i32, %c0_i32_0 : i32, i32
  }
  func.func @transform_3(%arg0: i32) -> (i32, i32) {
    %c0_i32 = arith.constant 0 : i32
    %c0_i32_0 = arith.constant 0 : i32
    return %arg0, %c0_i32 : i32, i32
  }
}

</mosaic_0001>

<bundles_post_ra>
// kernel: model1_forward.1
= control target key start
LH: loop header
LB: loop body
LE: loop exit
PB: predicated region body
PF: predicated region fallthrough
CT: control target
= control target key end

     0   :  { %8 = vsyncpa [#allocation3], 0  ;;  %s408_s12 = smov [#allocation2]   ;;  %s477_s0 = inlined_call_operand.vmem [shape: f32[8,1], index: 0, kind: input, shape index: {}]   ;;  %s478_s1 = inlined_call_operand.hbm [shape: f32[3,24,128], index: 1, kind: input, shape index: {}]   ;;  %s479_s2 = inlined_call_operand.vmem [shape: f32[8,128], index: 2, kind: input, shape index: {}]   ;;  %s480_s3 = inlined_call_operand.vmem [shape: f32[8,1], index: 3, kind: output, shape index: {}]  }
   0x1   :  { %s16_s13 = sshll.u32 %s408_s12, 4  ;;  %s384_s16 = scalar_lea.hbm %s478_s1, 1152  ;;  %s17_s13 = int_to_ptr.vmem [resolvable:$true] %s16_s13 }
   0x2   :  { %p385_p0 = scmp.ne.s32.totalorder %s478_s1, %s384_s16  ;;  %p388_p1 = scmp.lt.u32.totalorder %s384_s16, %s478_s1 }
   0x4   :  { %p390_p2 = pnand %p388_p1, %p385_p0 }
   0x6   :  { %393 = shalt.err (!%p390_p2)
}
   0x7   :  { %s394_s21 = scalar_lea.vmem %s17_s13, 1152  ;;  %p399_p4 = scmp.lt.s32.totalorder %s17_s13, %s17_s13 }
   0x8   :  { %p395_p3 = scmp.ne.s32.totalorder %s17_s13, %s394_s21  ;;  %p400_p5 = scmp.lt.s32.totalorder %s394_s21, %s394_s21 }
   0xa   :  { %p401_p6 = por %p400_p5, %p399_p4 }
   0xc   :  { %p402_p7 = pnand %p401_p6, %p395_p3 }
   0xe   :  { %405 = shalt.err (!%p402_p7)
}
   0xf   :  { %s409_s22 = smov 128   ;;  %s410_s23 = smov 8  }
  0x10   :  { %22 = dma.hbm_to_vmem [thread:$0]  %s478_s1, 1152, %s17_s13, [#allocation3], %s409_s22, %s409_s22, %s410_s23  }
  0x11   :  { %406 = dma.done.wait [#allocation3], 1152  }
  0x12   :  { %407 = vsyncadd [#allocation3], 4294966144  ;;  %v411_v0 = vmov 0   ;;  %v28_v1 = vld [vmem:[%s477_s0] sm:$0xff]  ;;  %v412_v2 = vmov 0.0|0.0   ;;  %v47_v3 = vld [vmem:[#allocation2] sm:$0xff] }
  0x13   :  { %383 = vset.pattern.permute.xlu0 %v411_v0  ;;  %367 = vmatprep.subr.bf16.mxu0 %v412_v2  ;;  %v48_v4 = vld [vmem:[#allocation2 + $0x8] sm:$0xff]  ;;  %v413_v6 = vmov 0.0   ;;  %v49_v7 = vld [vmem:[#allocation2 + $0x10] sm:$0xff]  ;;  %vm414_vm0 = vmmov 0   ;;  %v318_v8 = vld [vmem:[%s479_s2] ss:$0 sm:$0xff] }
  0x14   :  { %33 = vperm.xlu0 %383, %v28_v1   ;;  %v368_v5 = vpack.c.bf16 %v48_v4, %v47_v3  ;;  %370 = vmatprep.subr.bf16.mxu1 %v412_v2  ;;  %v319_v9 = vld [vmem:[%s479_s2 + $0x2] ss:$0 sm:$0xff]  ;;  %vm55_vm1 = vcmask 195584   ;;  %v132_v15 = vld [vmem:[#allocation2 + $0x20] sm:$0xff]  ;;  %v133_v17 = vld [vmem:[#allocation2 + $0x28] sm:$0xff]  ;;  %vm311_vm2 = vcmask 7168  }
  0x15   :  { %346 = vmatprep.mubr.msk.f32.mxu0 %vm414_vm0, %v413_v6  ;;  %355 = vmatprep.mubr.msk.f32.mxu1 %vm414_vm0, %v413_v6  ;;  %v131_v14 = vld [vmem:[#allocation2 + $0x18] sm:$0xff]  ;;  %v214_v18 = vld [vmem:[#allocation2 + $0x30] sm:$0xff]  ;;  %v216_v26 = vld [vmem:[#allocation2 + $0x40] sm:$0xff] }
  0x16   :  { %369 = vmatpush3.bf16.msra.mxu0 %v368_v5  ;;  %v371_v16 = vpack.c.bf16 %v132_v15, %v131_v14  ;;  %v215_v19 = vld [vmem:[#allocation2 + $0x38] sm:$0xff] }
  0x17   :  { %344 = vmatprep.subr.mxu0 %v413_v6  ;;  %v374_v20 = vpack.c.bf16 %v215_v19, %v214_v18  ;;  %v320_v21 = vld [vmem:[%s479_s2 + $0x3] ss:$0 sm:$0xff]  ;;  %v322_v27 = vld [vmem:[%s479_s2 + $0x4] ss:$0 sm:$0xff]  ;;  %v324_v32 = vld [vmem:[%s479_s2 + $0x5] ss:$0 sm:$0xff] }
  0x18   :  { %372 = vmatpush3.bf16.msra.mxu1 %v371_v16  ;;  %v326_v36 = vld [vmem:[%s479_s2 + $0x1] ss:$0 sm:$0xff]  ;;  %v327_v38 = vld [vmem:[%s479_s2 + $0x6] ss:$0 sm:$0xff] }
  0x19   :  { %353 = vmatprep.subr.mxu1 %v413_v6 }
  0x1a   :  { %345 = vmatpush3.msra.mxu0 %v49_v7 }
  0x1b   :  { %373 = vmatprep.subr.bf16.mxu0 %v412_v2 }
  0x1c   :  { %354 = vmatpush3.msra.mxu1 %v133_v17 }
  0x93   :  { %v34_v10 = vpop.permute.xlu0 %33 }
  0x94   :  { %v40_v11 = vmul.f32 %v318_v8, %v34_v10 }
  0x96   :  { %v45_v12 = vadd.f32 %v319_v9, %v40_v11 }
  0x98   :  { %v46_v13 = vmax.f32 %v45_v12, 0.0 }
  0x9a   :  { %347 = vmatmul.mubr.msk.f32.vlgmr.msra.gmra.mrb[0].mxu0 %vm55_vm1, %v46_v13 }
  0x9b   :  { %364 = vmatprep.mubr.msk.f32.mxu0 %vm414_vm0, %v413_v6  ;;  %375 = vmatpush3.bf16.msra.mxu0 %v374_v20 }
  0x9c   :  { %362 = vmatprep.subr.mxu0 %v413_v6 }
  0x9f   :  { %363 = vmatpush3.msra.mxu0 %v216_v26 }
 0x16d   :  { %v125_v22 = vpop.f32.mrb[0].mxu0 }
 0x16e   :  { %v126_v23 = vadd.f32 %v320_v21, %v125_v22  ;;  %v348_v24 = vpop.f32.mrb[1].mxu0 }
 0x170   :  { %v129_v25 = vmax.f32 %v126_v23, 0.0 }
 0x172   :  { %356 = vmatmul.mubr.msk.f32.vlgmr.msra.gmra.mrb[0].mxu1 %vm55_vm1, %v129_v25 }
 0x245   :  { %v208_v28 = vpop.f32.mrb[0].mxu1 }
 0x246   :  { %v209_v29 = vadd.f32 %v322_v27, %v208_v28  ;;  %v357_v30 = vpop.f32.mrb[1].mxu1 }
 0x248   :  { %v212_v31 = vmax.f32 %v209_v29, 0.0 }
 0x24a   :  { %365 = vmatmul.mubr.msk.f32.vlgmr.msra.gmra.mrb[2].mxu0 %vm55_vm1, %v212_v31 }
 0x31d   :  { %v291_v33 = vpop.f32.mrb[2].mxu0 }
 0x31e   :  { %v292_v34 = vadd.f32 %v324_v32, %v291_v33  ;;  %v366_v35 = vpop.f32.mrb[3].mxu0 }
 0x320   :  { %v295_v37 = vmax.f32 %v292_v34, 0.0 }
 0x322   :  { %v302_v39 = vmul.f32 %v326_v36, %v295_v37 }
 0x324   :  { %v307_v40 = vadd.f32 %v327_v38, %v302_v39 }
 0x326   :  { %308 = vadd.xlane.f32.xlu0 %v307_v40 }
 0x3b3   :  { %v309_v41 = vpop.xlane.xlu0 %308 }
 0x3b4   :  { %v310_v42 = vmax.f32 %v309_v41, 0.0 }
 0x3b6   :  { %312 = vst.msk [vmem:[%s480_s3] sm:$0xff] %vm311_vm2, %v310_v42 }
 0x3b7   :  { %317 = vsyncpa [#allocation3], 1 }

</bundles_post_ra>
